<compile_context>
chip_gen: v7x
topology: tpu7x:2x2x1
jax: 0.10.0
libtpu: 0.0.40
codegen_flags: <defaults>
</compile_context>

<pallas_src>
import jax
import jax.numpy as jnp
from jax.experimental import pallas as pl
from jax.experimental.pallas import tpu as pltpu


def _round_up(x, m):
    return ((x + m - 1) // m) * m


def _mlp_kernel(x_ref, w1_ref, b1_ref, w2_ref, b2_ref, w3_ref, b3_ref, o_ref):
    # Layer 1: Linear (bf16 MXU operands, f32 accumulate) + f32 bias + f32 tanh
    h = jnp.dot(x_ref[...], w1_ref[...], preferred_element_type=jnp.float32)
    h = jnp.tanh(h + b1_ref[...])
    # Layer 2: Linear + tanh (cast only the dot operand back to bf16)
    h = jnp.dot(h.astype(jnp.bfloat16), w2_ref[...],
                preferred_element_type=jnp.float32)
    h = jnp.tanh(h + b2_ref[...])
    # Output layer: Linear, no activation ('None' layers are filtered in torch)
    y = jnp.dot(h.astype(jnp.bfloat16), w3_ref[...],
                preferred_element_type=jnp.float32)
    o_ref[...] = (y + b3_ref[...]).astype(o_ref.dtype)


def mlp_forward(x, params, *, tile_m=256):
    """Fused MLP forward pass.

    x: (B, input_size) float32
    params: dict with w1 (in,h0), b1 (1,h0), w2 (h0,h1), b2 (1,h1),
            w3 (h1,out), b3 (1,out)   [weights stored as (in, out), i.e. the
            transpose of PyTorch's Linear.weight, so y = x @ W + b]
    returns: (B, out) float32
    """
    B, in_dim = x.shape
    h0 = params["w1"].shape[1]
    h1 = params["w2"].shape[1]
    out_dim = params["w3"].shape[1]

    # Batch tile: multiple of 8 (f32/bf16 sublane), large enough to amortize
    # per-step overhead and the masked partial stores on the 8-lane output.
    tm = _round_up(min(tile_m, max(8, _round_up(B, 8))), 8)
    b_pad = _round_up(B, tm)
    if b_pad != B:
        x = jnp.pad(x, ((0, b_pad - B), (0, 0)))

    # bf16 matmul operands; biases stay f32 (added in f32 inside the kernel).
    x_bf = x.astype(jnp.bfloat16)
    w1 = params["w1"].astype(jnp.bfloat16)
    w2 = params["w2"].astype(jnp.bfloat16)
    w3 = params["w3"].astype(jnp.bfloat16)
    b1 = params["b1"].astype(jnp.float32)
    b2 = params["b2"].astype(jnp.float32)
    b3 = params["b3"].astype(jnp.float32)

    grid = (b_pad // tm,)

    # Explicit per-operand index_maps (no late-binding closure): activations
    # walk the batch axis; weights / biases are VMEM-resident (always block 0).
    in_specs = [
        pl.BlockSpec((tm, in_dim), lambda i: (i, 0)),     # x
        pl.BlockSpec((in_dim, h0), lambda i: (0, 0)),     # w1
        pl.BlockSpec((1, h0), lambda i: (0, 0)),          # b1
        pl.BlockSpec((h0, h1), lambda i: (0, 0)),         # w2
        pl.BlockSpec((1, h1), lambda i: (0, 0)),          # b2
        pl.BlockSpec((h1, out_dim), lambda i: (0, 0)),    # w3
        pl.BlockSpec((1, out_dim), lambda i: (0, 0)),     # b3
    ]
    out_spec = pl.BlockSpec((tm, out_dim), lambda i: (i, 0))

    flops = 2 * b_pad * (in_dim * h0 + h0 * h1 + h1 * out_dim)
    transcendentals = b_pad * (h0 + h1)
    bytes_accessed = (
        x_bf.size * 2 + b_pad * out_dim * 4
        + (w1.size + w2.size + w3.size) * 2
        + (b1.size + b2.size + b3.size) * 4
    )

    out = pl.pallas_call(
        _mlp_kernel,
        out_shape=jax.ShapeDtypeStruct((b_pad, out_dim), jnp.float32),
        grid=grid,
        in_specs=in_specs,
        out_specs=out_spec,
        compiler_params=pltpu.CompilerParams(
            dimension_semantics=("parallel",)),
        cost_estimate=pl.CostEstimate(
            flops=flops,
            transcendentals=transcendentals,
            bytes_accessed=bytes_accessed),
    )(x_bf, w1, b1, w2, b2, w3, b3)

    return out[:B] if b_pad != B else out


def init_params(key, input_size, hidden_sizes, output_size):
    """Deterministic init matching torch.nn.Linear's default U(-1/sqrt(fan_in), +)."""
    sizes = [input_size] + list(hidden_sizes) + [output_size]
    params = {}
    for i, (fan_in, fan_out) in enumerate(zip(sizes[:-1], sizes[1:]), start=1):
        key, kw, kb = jax.random.split(key, 3)
        bound = 1.0 / jnp.sqrt(fan_in)
        # stored as (in, out) so the kernel computes x @ W + b
        params[f"w{i}"] = jax.random.uniform(
            kw, (fan_in, fan_out), jnp.float32, -bound, bound)
        params[f"b{i}"] = jax.random.uniform(
            kb, (1, fan_out), jnp.float32, -bound, bound)
    return params


def reference_forward(x, params):
    """Mirror of the kernel math (bf16 matmul operands, f32 accumulate/act)."""
    def bf(a):
        return a.astype(jnp.bfloat16).astype(jnp.float32)
    h = jnp.tanh(bf(x) @ bf(params["w1"]) + params["b1"])
    h = jnp.tanh(bf(h) @ bf(params["w2"]) + params["b2"])
    return bf(h) @ bf(params["w3"]) + params["b3"]


def reference_forward_f32(x, params):
    """Pure-f32 reference (what the torch module computes)."""
    h = jnp.tanh(x @ params["w1"] + params["b1"])
    h = jnp.tanh(h @ params["w2"] + params["b2"])
    return h @ params["w3"] + params["b3"]


if __name__ == "__main__":
    # Synthetic config implied by the module's __init__ / params dict.
    batch = 1024              # large enough to exercise the batch-tiled grid
    input_size = 16           # self.input_data.shape[1]
    hidden_sizes = [32, 32]   # nn_params_dict['hidden_layers_sizes']
    output_size = 8           # self.target_data.shape[1]

    key = jax.random.PRNGKey(0)
    key, kx = jax.random.split(key)
    x = jax.random.normal(kx, (batch, input_size), jnp.float32)
    params = init_params(key, input_size, hidden_sizes, output_size)

    out = mlp_forward(x, params, tile_m=256)   # grid = (4,)
    out = jax.block_until_ready(out)
    assert out.shape == (batch, output_size)

    # Tight check against a reference that mirrors the kernel's bf16/f32 mix.
    ref = reference_forward(x, params)
    assert jnp.allclose(out, ref, atol=1e-3, rtol=1e-3), "mismatch vs mirror reference"

    # Loose check against the pure-f32 torch-equivalent math (bf16 operand cast).
    ref32 = reference_forward_f32(x, params)
    assert jnp.allclose(out, ref32, atol=5e-2, rtol=5e-2), "mismatch vs f32 reference"

    print("KERNEL_OK")
</pallas_src>

<mosaic_0001>
module attributes {stable_mosaic.version = 11 : i64} {
  func.func @_mlp_kernel(%arg0: i32, %arg1: memref<256x16xbf16, #tpu.memory_space<vmem>>, %arg2: memref<16x32xbf16, #tpu.memory_space<vmem>>, %arg3: memref<1x32xf32, #tpu.memory_space<vmem>>, %arg4: memref<32x32xbf16, #tpu.memory_space<vmem>>, %arg5: memref<1x32xf32, #tpu.memory_space<vmem>>, %arg6: memref<32x8xbf16, #tpu.memory_space<vmem>>, %arg7: memref<1x8xf32, #tpu.memory_space<vmem>>, %arg8: memref<256x8xf32, #tpu.memory_space<vmem>>) attributes {dimension_semantics = [#tpu.dimension_semantics<parallel>], iteration_bounds = array<i64: 4>, scalar_prefetch = 0 : i64, scratch_operands = 0 : i64, tpu.core_type = #tpu.core_type<tc>, window_params = [{transform_indices = @transform_0, window_bounds = array<i64: 256, 16>}, {pipeline_mode = #tpu.pipeline_mode<synchronous>, transform_indices = @transform_1, window_bounds = array<i64: 16, 32>}, {pipeline_mode = #tpu.pipeline_mode<synchronous>, transform_indices = @transform_2, window_bounds = array<i64: 1, 32>}, {pipeline_mode = #tpu.pipeline_mode<synchronous>, transform_indices = @transform_3, window_bounds = array<i64: 32, 32>}, {pipeline_mode = #tpu.pipeline_mode<synchronous>, transform_indices = @transform_4, window_bounds = array<i64: 1, 32>}, {pipeline_mode = #tpu.pipeline_mode<synchronous>, transform_indices = @transform_5, window_bounds = array<i64: 32, 8>}, {pipeline_mode = #tpu.pipeline_mode<synchronous>, transform_indices = @transform_6, window_bounds = array<i64: 1, 8>}, {transform_indices = @transform_7, window_bounds = array<i64: 256, 8>}]} {
    %c0 = arith.constant 0 : index
    %c0_0 = arith.constant 0 : index
    %0 = vector.load %arg1[%c0, %c0_0] : memref<256x16xbf16, #tpu.memory_space<vmem>>, vector<256x16xbf16>
    %c0_1 = arith.constant 0 : index
    %c0_2 = arith.constant 0 : index
    %1 = vector.load %arg2[%c0_1, %c0_2] : memref<16x32xbf16, #tpu.memory_space<vmem>>, vector<16x32xbf16>
    %cst = arith.constant dense<0.000000e+00> : vector<256x32xf32>
    %2 = tpu.matmul %0, %1, %cst {dimension_numbers = #tpu.dot_dimension_numbers<[1], [0], [0], [1], [0, 0, 1, 1], [], []>} : vector<256x16xbf16>, vector<16x32xbf16>, vector<256x32xf32> -> vector<256x32xf32>
    %c0_3 = arith.constant 0 : index
    %c0_4 = arith.constant 0 : index
    %3 = vector.load %arg3[%c0_3, %c0_4] : memref<1x32xf32, #tpu.memory_space<vmem>>, vector<1x32xf32>
    %4 = vector.broadcast %3 : vector<1x32xf32> to vector<256x32xf32>
    %5 = arith.addf %2, %4 : vector<256x32xf32>
    %6 = math.tanh %5 : vector<256x32xf32>
    %7 = arith.truncf %6 : vector<256x32xf32> to vector<256x32xbf16>
    %c0_5 = arith.constant 0 : index
    %c0_6 = arith.constant 0 : index
    %8 = vector.load %arg4[%c0_5, %c0_6] : memref<32x32xbf16, #tpu.memory_space<vmem>>, vector<32x32xbf16>
    %cst_7 = arith.constant dense<0.000000e+00> : vector<256x32xf32>
    %9 = tpu.matmul %7, %8, %cst_7 {dimension_numbers = #tpu.dot_dimension_numbers<[1], [0], [0], [1], [0, 0, 1, 1], [], []>} : vector<256x32xbf16>, vector<32x32xbf16>, vector<256x32xf32> -> vector<256x32xf32>
    %c0_8 = arith.constant 0 : index
    %c0_9 = arith.constant 0 : index
    %10 = vector.load %arg5[%c0_8, %c0_9] : memref<1x32xf32, #tpu.memory_space<vmem>>, vector<1x32xf32>
    %11 = vector.broadcast %10 : vector<1x32xf32> to vector<256x32xf32>
    %12 = arith.addf %9, %11 : vector<256x32xf32>
    %13 = math.tanh %12 : vector<256x32xf32>
    %14 = arith.truncf %13 : vector<256x32xf32> to vector<256x32xbf16>
    %c0_10 = arith.constant 0 : index
    %c0_11 = arith.constant 0 : index
    %15 = vector.load %arg6[%c0_10, %c0_11] : memref<32x8xbf16, #tpu.memory_space<vmem>>, vector<32x8xbf16>
    %cst_12 = arith.constant dense<0.000000e+00> : vector<256x8xf32>
    %16 = tpu.matmul %14, %15, %cst_12 {dimension_numbers = #tpu.dot_dimension_numbers<[1], [0], [0], [1], [0, 0, 1, 1], [], []>} : vector<256x32xbf16>, vector<32x8xbf16>, vector<256x8xf32> -> vector<256x8xf32>
    %c0_13 = arith.constant 0 : index
    %c0_14 = arith.constant 0 : index
    %17 = vector.load %arg7[%c0_13, %c0_14] : memref<1x8xf32, #tpu.memory_space<vmem>>, vector<1x8xf32>
    %18 = vector.broadcast %17 : vector<1x8xf32> to vector<256x8xf32>
    %19 = arith.addf %16, %18 : vector<256x8xf32>
    %c0_15 = arith.constant 0 : index
    %c0_16 = arith.constant 0 : index
    %20 = vector.load %arg8[%c0_15, %c0_16] : memref<256x8xf32, #tpu.memory_space<vmem>>, vector<256x8xf32>
    tpu.vector_store %arg8[%c0_15, %c0_16], %19 {strides = array<i32>} : memref<256x8xf32, #tpu.memory_space<vmem>>, vector<256x8xf32>,
    return
  }
  func.func @transform_0(%arg0: i32) -> (i32, i32) {
    %c0_i32 = arith.constant 0 : i32
    %c0_i32_0 = arith.constant 0 : i32
    return %arg0, %c0_i32 : i32, i32
  }
  func.func @transform_1(%arg0: i32) -> (i32, i32) {
    %c0_i32 = arith.constant 0 : i32
    %c0_i32_0 = arith.constant 0 : i32
    %c0_i32_1 = arith.constant 0 : i32
    return %c0_i32, %c0_i32_0 : i32, i32
  }
  func.func @transform_2(%arg0: i32) -> (i32, i32) {
    %c0_i32 = arith.constant 0 : i32
    %c0_i32_0 = arith.constant 0 : i32
    %c0_i32_1 = arith.constant 0 : i32
    return %c0_i32, %c0_i32_0 : i32, i32
  }
  func.func @transform_3(%arg0: i32) -> (i32, i32) {
    %c0_i32 = arith.constant 0 : i32
    %c0_i32_0 = arith.constant 0 : i32
    %c0_i32_1 = arith.constant 0 : i32
    return %c0_i32, %c0_i32_0 : i32, i32
  }
  func.func @transform_4(%arg0: i32) -> (i32, i32) {
    %c0_i32 = arith.constant 0 : i32
    %c0_i32_0 = arith.constant 0 : i32
    %c0_i32_1 = arith.constant 0 : i32
    return %c0_i32, %c0_i32_0 : i32, i32
  }
  func.func @transform_5(%arg0: i32) -> (i32, i32) {
    %c0_i32 = arith.constant 0 : i32
    %c0_i32_0 = arith.constant 0 : i32
    %c0_i32_1 = arith.constant 0 : i32
    return %c0_i32, %c0_i32_0 : i32, i32
  }
  func.func @transform_6(%arg0: i32) -> (i32, i32) {
    %c0_i32 = arith.constant 0 : i32
    %c0_i32_0 = arith.constant 0 : i32
    %c0_i32_1 = arith.constant 0 : i32
    return %c0_i32, %c0_i32_0 : i32, i32
  }
  func.func @transform_7(%arg0: i32) -> (i32, i32) {
    %c0_i32 = arith.constant 0 : i32
    %c0_i32_0 = arith.constant 0 : i32
    return %arg0, %c0_i32 : i32, i32
  }
}

</mosaic_0001>

<bundles_post_ra>
// kernel: tpu_custom_call.1
= control target key start
LH: loop header
LB: loop body
LE: loop exit
PB: predicated region body
PF: predicated region fallthrough
CT: control target
= control target key end

     0   :  { %s1719_s24 = smov 0   ;;  %s2007_s0 = inlined_call_operand.vmem [shape: bf16[1024,16], index: 0, kind: input, shape index: {}]   ;;  %s2008_s1 = inlined_call_operand.vmem [shape: bf16[16,32], index: 1, kind: input, shape index: {}]   ;;  %s2009_s2 = inlined_call_operand.vmem [shape: f32[1,32], index: 2, kind: input, shape index: {}]   ;;  %s2010_s3 = inlined_call_operand.vmem [shape: bf16[32,32], index: 3, kind: input, shape index: {}]   ;;  %s2011_s4 = inlined_call_operand.vmem [shape: f32[1,32], index: 4, kind: input, shape index: {}]   ;;  %s2012_s5 = inlined_call_operand.vmem [shape: bf16[32,8], index: 5, kind: input, shape index: {}]   ;;  %s2013_s6 = inlined_call_operand.vmem [shape: f32[1,8], index: 6, kind: input, shape index: {}]   ;;  %s2014_s7 = inlined_call_operand.vmem [shape: f32[1024,8], index: 7, kind: output, shape index: {}]  }
   0x1 LB: > { %s1270_s25 = sadd.s32 4294967295, %s1677_s24   ;;  %p1274_p0 = scmp.ge.s32.totalorder %s1677_s24, 1  ;;  %s1677_s24 = sphi %s1719_s24, %s17_s24  }
   0x2   : > { %p238_p1 = scmp.lt.s32.totalorder %s1677_s24, 5 }
   0x4   : > { %p239_p2 = pnand %p1274_p0, %p238_p1 }
   0x5   : > { %v1522_v0 = vld [vmem:[%s2008_s1] sm:$0xff] (!%p239_p2)   ;;  %s1275_s28 = sshll.u32 (!%p239_p2), %s1270_s25, 5  ;;  %vm410_vm0 = vcmask (!%p239_p2), 130048   ;;  %v1540_v18 = vld [vmem:[%s2010_s3 + $0x8] sm:$0xff] (!%p239_p2)   ;;  %vm691_vm1 = vcmask (!%p239_p2), 261120   ;;  %vm1181_vm2 = vcmask (!%p239_p2), 64512  }
   0x6   : > { %242 = sbr.rel (%p239_p2) target bundleno = 754 (0x2f2), region = 48  ;;  %p271_p3 = scmp.lt.s32.totalorder (!%p239_p2), %s1275_s28, 127  ;;  %1406 = vmatprep.subr.bf16.mxu0 (!%p239_p2), %v1522_v0  ;;  %1512 = vmatprep.subr.bf16.mxu1 (!%p239_p2), %v1522_v0  ;;  %v1539_v1 = vld [vmem:[%s2010_s3] sm:$0xff] (!%p239_p2)  }
   0x7   : > { %1407 = vmatpush3.bf16.msra.mxu0 (!%p239_p2), %v1522_v0  ;;  %1513 = vmatpush3.bf16.msra.mxu1 (!%p239_p2), %v1522_v0  ;;  %v1541_v19 = vld [vmem:[%s2012_s5] sm:$0xff] (!%p239_p2)  }
   0x8   : > { %1440 = vmatprep.subr.bf16.mxu1 (!%p239_p2), %v1539_v1  ;;  %1476 = vmatprep.subr.bf16.mxu0 (!%p239_p2), %v1541_v19  ;;  %v1782_v20 = vld [vmem:[%s2009_s2] ss:$0 sm:$0xff] (!%p239_p2) }
   0xd   : > { %s2016_s28 = smov (!%p271_p3, %s1275_s28), 127 }
   0xe   : > { %s1276_s8 = sshll.u32 %s2016_s28, 2  ;;  %s1278_s22 = sshll.u32 %s2016_s28, 3 }
   0xf   : > { %s1739_s11 = scalar_lea.vmem %s2007_s0, %s1276_s8  ;;  %s1906_s29 = scalar_lea.vmem %s2014_s7, %s1278_s22 }
  0x10   : > { %v1523_v2 = vld [vmem:[%s1739_s11] sm:$0xff]   ;;  %v1524_v3 = vld [vmem:[%s1739_s11 + $0x8] sm:$0xff]   ;;  %v1525_v4 = vld [vmem:[%s1739_s11 + $0x10] sm:$0xff]  }
  0x11   : > { %1408 = vmatprep.mubr.msk.bf16.mxu0 %vm410_vm0, %v1523_v2  ;;  %v1526_v5 = vld [vmem:[%s1739_s11 + $0x18] sm:$0xff]   ;;  %v1527_v6 = vld [vmem:[%s1739_s11 + $0x20] sm:$0xff]   ;;  %v1532_v8 = vld [vmem:[%s1739_s11 + $0x48] sm:$0xff]  }
  0x12   : > { %1409 = vmatmul.mubr.msk.bf16.vlgmr.msra.gmra.mrb[0].mxu0 %vm410_vm0, %v1524_v3  ;;  %v1531_v7 = vld [vmem:[%s1739_s11 + $0x40] sm:$0xff]   ;;  %v1533_v9 = vld [vmem:[%s1739_s11 + $0x50] sm:$0xff]   ;;  %v1528_v10 = vld [vmem:[%s1739_s11 + $0x28] sm:$0xff]  }
  0x13   : > { %1412 = vmatprep.mubr.msk.bf16.mxu0 %vm410_vm0, %v1525_v4  ;;  %1424 = vmatprep.mubr.msk.bf16.mxu1 %vm410_vm0, %v1531_v7  ;;  %v1534_v11 = vld [vmem:[%s1739_s11 + $0x58] sm:$0xff]   ;;  %v1529_v12 = vld [vmem:[%s1739_s11 + $0x30] sm:$0xff]   ;;  %v1535_v13 = vld [vmem:[%s1739_s11 + $0x60] sm:$0xff]  }
  0x14   : > { %1425 = vmatmul.mubr.msk.bf16.vlgmr.msra.gmra.mrb[0].mxu1 %vm410_vm0, %v1532_v8  ;;  %v1530_v14 = vld [vmem:[%s1739_s11 + $0x38] sm:$0xff]   ;;  %v1536_v15 = vld [vmem:[%s1739_s11 + $0x68] sm:$0xff]   ;;  %v1537_v16 = vld [vmem:[%s1739_s11 + $0x70] sm:$0xff]   ;;  %1477 = vmatpush3.bf16.msra.mxu0 %v1541_v19 }
  0x15   : > { %1428 = vmatprep.mubr.msk.bf16.mxu1 %vm410_vm0, %v1533_v9  ;;  %1441 = vmatpush3.bf16.msra.mxu1 %v1539_v1  ;;  %v1538_v17 = vld [vmem:[%s1739_s11 + $0x78] sm:$0xff]  }
  0x16   : > { %1442 = vmatprep.subr.bf16.mxu1 %v1540_v18 }
  0x19   : > { %1443 = vmatpush3.bf16.msra.mxu1 %v1540_v18 }
  0x1a   : > { %1413 = vmatmul.mubr.msk.bf16.gmra.mrb[4].mxu0 %vm410_vm0, %v1526_v5 }
  0x1b   : > { %1416 = vmatprep.mubr.msk.bf16.mxu0 %vm410_vm0, %v1527_v6 }
  0x1c   : > { %1429 = vmatmul.mubr.msk.bf16.gmra.mrb[4].mxu1 %vm410_vm0, %v1534_v11 }
  0x1d   : > { %1432 = vmatprep.mubr.msk.bf16.mxu1 %vm410_vm0, %v1535_v13 }
  0x22   : > { %1417 = vmatmul.mubr.msk.bf16.gmra.mrb[8].mxu0 %vm410_vm0, %v1528_v10 }
  0x23   : > { %1420 = vmatprep.mubr.msk.bf16.mxu0 %vm410_vm0, %v1529_v12 }
  0x24   : > { %1433 = vmatmul.mubr.msk.bf16.gmra.mrb[8].mxu1 %vm410_vm0, %v1536_v15 }
  0x25   : > { %1436 = vmatprep.mubr.msk.bf16.mxu1 %vm410_vm0, %v1537_v16 }
  0x2a   : > { %1421 = vmatmul.mubr.msk.bf16.gmra.mrb[12].mxu0 %vm410_vm0, %v1530_v14 }
  0x2c   : > { %1437 = vmatmul.mubr.msk.bf16.gmra.mrb[12].mxu1 %vm410_vm0, %v1538_v17 }
  0xe5   : > { %v1410_v21 = vpop.f32.mrb[0].mxu0 }
  0xe6   : > { %v502_v22 = vadd.f32 %v1410_v21, %v1782_v20  ;;  %v493_v23 = vpop.f32.mrb[1].mxu0 }
  0xe7   : > { %v494_v24 = vadd.f32 %v1782_v20, %v493_v23  ;;  %v1411_v25 = vpop.f32.mrb[2].mxu0  ;;  %v1426_v30 = vpop.f32.mrb[0].mxu1 }
  0xe8   : > { %1543 = vtanh.f32 %v502_v22  ;;  %v505_v26 = vadd.f32 %v1411_v25, %v1782_v20  ;;  %v496_v27 = vpop.f32.mrb[3].mxu0  ;;  %v557_v33 = vpop.f32.mrb[1].mxu1  ;;  %v566_v39 = vadd.f32 %v1426_v30, %v1782_v20 }
  0xe9   : > { %1545 = vtanh.f32 %v494_v24  ;;  %v497_v28 = vadd.f32 %v1782_v20, %v496_v27  ;;  %v1427_v36 = vpop.f32.mrb[2].mxu1  ;;  %v558_v42 = vadd.f32 %v1782_v20, %v557_v33 }
  0xea   : > { %1547 = vtanh.f32 %v505_v26  ;;  %v560_v40 = vpop.f32.mrb[3].mxu1  ;;  %v569_v44 = vadd.f32 %v1427_v36, %v1782_v20 }
  0xeb   : > { %1549 = vtanh.f32 %v497_v28  ;;  %v561_v46 = vadd.f32 %v1782_v20, %v560_v40 }
  0xed   : > { %v1414_v29 = vpop.f32.mrb[4].mxu0 }
  0xee   : > { %v518_v31 = vadd.f32 %v1414_v29, %v1782_v20  ;;  %v509_v32 = vpop.f32.mrb[5].mxu0 }
  0xef   : > { %v510_v34 = vadd.f32 %v1782_v20, %v509_v32  ;;  %v1415_v35 = vpop.f32.mrb[6].mxu0  ;;  %v1430_v51 = vpop.f32.mrb[4].mxu1 }
  0xf0   : > { %1551 = vtanh.f32 %v518_v31  ;;  %v521_v37 = vadd.f32 %v1415_v35, %v1782_v20  ;;  %v512_v38 = vpop.f32.mrb[7].mxu0  ;;  %v573_v55 = vpop.f32.mrb[5].mxu1  ;;  %v582_v61 = vadd.f32 %v1430_v51, %v1782_v20 }
  0xf1   : > { %1553 = vtanh.f32 %v510_v34  ;;  %v513_v41 = vadd.f32 %v1782_v20, %v512_v38  ;;  %v1431_v58 = vpop.f32.mrb[6].mxu1  ;;  %v574_v0 = vadd.f32 %v1782_v20, %v573_v55 }
  0xf2   : > { %v1544_v43 = vpop.eup %1543  ;;  %1555 = vtanh.f32 %v521_v37  ;;  %v576_v62 = vpop.f32.mrb[7].mxu1  ;;  %v585_v2 = vadd.f32 %v1431_v58, %v1782_v20 }
  0xf3   : > { %v1546_v45 = vpop.eup %1545  ;;  %1557 = vtanh.f32 %v513_v41  ;;  %v577_v4 = vadd.f32 %v1782_v20, %v576_v62 }
  0xf4   : > { %v1548_v47 = vpop.eup %1547  ;;  %1559 = vtanh.f32 %v566_v39 }
  0xf5   : > { %v1550_v48 = vpop.eup %1549  ;;  %v653_v49 = vpack.c.bf16 %v1548_v47, %v1544_v43  ;;  %v1418_v50 = vpop.f32.mrb[8].mxu0  ;;  %1561 = vtanh.f32 %v558_v42 }
  0xf6   : > { %v534_v52 = vadd.f32 %v1418_v50, %v1782_v20  ;;  %v525_v53 = vpop.f32.mrb[9].mxu0  ;;  %v652_v54 = vpack.c.bf16 %v1550_v48, %v1546_v45  ;;  %1563 = vtanh.f32 %v569_v44 }
  0xf7   : > { %v526_v56 = vadd.f32 %v1782_v20, %v525_v53  ;;  %v1419_v57 = vpop.f32.mrb[10].mxu0  ;;  %1565 = vtanh.f32 %v561_v46  ;;  %v1434_v9 = vpop.f32.mrb[8].mxu1 }
  0xf8   : > { %1567 = vtanh.f32 %v534_v52  ;;  %v537_v59 = vadd.f32 %v1419_v57, %v1782_v20  ;;  %v528_v60 = vpop.f32.mrb[11].mxu0  ;;  %1444 = vmatprep.mubr.msk.bf16.mxu1 %vm691_vm1, %v652_v54  ;;  %v589_v14 = vpop.f32.mrb[9].mxu1  ;;  %v598_v23 = vadd.f32 %v1434_v9, %v1782_v20 }
  0xf9   : > { %1569 = vtanh.f32 %v526_v56  ;;  %v529_v63 = vadd.f32 %v1782_v20, %v528_v60  ;;  %1445 = vmatmul.mubr.msk.bf16.vlgmr.msra.gmra.mrb[16].mxu1 %vm691_vm1, %v653_v49  ;;  %v1435_v18 = vpop.f32.mrb[10].mxu1  ;;  %v590_v27 = vadd.f32 %v1782_v20, %v589_v14 }
  0xfa   : > { %v1552_v1 = vpop.eup %1551  ;;  %1571 = vtanh.f32 %v537_v59  ;;  %v592_v24 = vpop.f32.mrb[11].mxu1  ;;  %v601_v30 = vadd.f32 %v1435_v18, %v1782_v20 }
  0xfb   : > { %v1554_v3 = vpop.eup %1553  ;;  %1573 = vtanh.f32 %v529_v63  ;;  %v593_v33 = vadd.f32 %v1782_v20, %v592_v24 }
  0xfc   : > { %v1556_v5 = vpop.eup %1555  ;;  %1575 = vtanh.f32 %v582_v61 }
  0xfd   : > { %v1558_v6 = vpop.eup %1557  ;;  %v1422_v7 = vpop.f32.mrb[12].mxu0  ;;  %v655_v8 = vpack.c.bf16 %v1556_v5, %v1552_v1  ;;  %1577 = vtanh.f32 %v574_v0  ;;  %v1542_v5 = vld [vmem:[%s2012_s5 + $0x8] sm:$0xff]  }
  0xfe   : > { %v1806_v10 = vpop.eup %1559  ;;  %v550_v11 = vadd.f32 %v1422_v7, %v1782_v20  ;;  %v541_v12 = vpop.f32.mrb[13].mxu0  ;;  %v654_v13 = vpack.c.bf16 %v1558_v6, %v1554_v3  ;;  %1579 = vtanh.f32 %v585_v2  ;;  %1478 = vmatprep.subr.bf16.mxu0 %v1542_v5  ;;  %v1847_v6 = vld [vmem:[%s2011_s4] ss:$0 sm:$0xff] }
  0xff   : > { %v1809_v15 = vpop.eup %1561  ;;  %v542_v16 = vadd.f32 %v1782_v20, %v541_v12  ;;  %v1423_v17 = vpop.f32.mrb[14].mxu0  ;;  %1581 = vtanh.f32 %v577_v4  ;;  %1479 = vmatpush3.bf16.msra.mxu0 %v1542_v5 }
 0x100   : > { %v1812_v19 = vpop.eup %1563  ;;  %1583 = vtanh.f32 %v550_v11  ;;  %v553_v21 = vadd.f32 %v1423_v17, %v1782_v20  ;;  %v544_v22 = vpop.f32.mrb[15].mxu0  ;;  %1448 = vmatprep.mubr.msk.bf16.mxu1 %vm691_vm1, %v654_v13 }
 0x101   : > { %v1566_v25 = vpop.eup %1565  ;;  %1585 = vtanh.f32 %v542_v16  ;;  %v545_v26 = vadd.f32 %v1782_v20, %v544_v22  ;;  %1449 = vmatmul.mubr.msk.bf16.gmra.mrb[20].mxu1 %vm691_vm1, %v655_v8  ;;  %v661_v28 = vpack.c.bf16 %v1812_v19, %v1806_v10  ;;  %v1438_v37 = vpop.f32.mrb[12].mxu1 }
 0x102   : > { %v1568_v29 = vpop.eup %1567  ;;  %1587 = vtanh.f32 %v553_v21  ;;  %v660_v31 = vpack.c.bf16 %v1566_v25, %v1809_v15  ;;  %v614_v40 = vadd.f32 %v1438_v37, %v1782_v20  ;;  %v605_v41 = vpop.f32.mrb[13].mxu1 }
 0x103   : > { %v1570_v32 = vpop.eup %1569  ;;  %1589 = vtanh.f32 %v545_v26  ;;  %v606_v43 = vadd.f32 %v1782_v20, %v605_v41  ;;  %v1439_v44 = vpop.f32.mrb[14].mxu1 }
 0x104   : > { %v1572_v34 = vpop.eup %1571  ;;  %1591 = vtanh.f32 %v598_v23  ;;  %v617_v46 = vadd.f32 %v1439_v44, %v1782_v20  ;;  %v608_v47 = vpop.f32.mrb[15].mxu1 }
 0x105   : > { %v1574_v35 = vpop.eup %1573  ;;  %v657_v36 = vpack.c.bf16 %v1572_v34, %v1568_v29  ;;  %1593 = vtanh.f32 %v590_v27  ;;  %v609_v49 = vadd.f32 %v1782_v20, %v608_v47 }
 0x106   : > { %v1576_v38 = vpop.eup %1575  ;;  %v656_v39 = vpack.c.bf16 %v1574_v35, %v1570_v32  ;;  %1595 = vtanh.f32 %v601_v30 }
 0x107   : > { %v1578_v42 = vpop.eup %1577  ;;  %1597 = vtanh.f32 %v593_v33 }
 0x108   : > { %v1580_v45 = vpop.eup %1579  ;;  %1452 = vmatprep.mubr.msk.bf16.mxu1 %vm691_vm1, %v656_v39  ;;  %1599 = vtanh.f32 %v614_v40 }
 0x109   : > { %v1582_v48 = vpop.eup %1581  ;;  %1453 = vmatmul.mubr.msk.bf16.gmra.mrb[24].mxu1 %vm691_vm1, %v657_v36  ;;  %1601 = vtanh.f32 %v606_v43  ;;  %v663_v50 = vpack.c.bf16 %v1580_v45, %v1576_v38 }
 0x10a   : > { %v1584_v51 = vpop.eup %1583  ;;  %1603 = vtanh.f32 %v617_v46  ;;  %v662_v52 = vpack.c.bf16 %v1582_v48, %v1578_v42 }
 0x10b   : > { %v1586_v53 = vpop.eup %1585  ;;  %1605 = vtanh.f32 %v609_v49 }
 0x10c   : > { %v1588_v54 = vpop.eup %1587 }
 0x10d   : > { %v1590_v55 = vpop.eup %1589  ;;  %v659_v56 = vpack.c.bf16 %v1588_v54, %v1584_v51 }
 0x10e   : > { %v1592_v57 = vpop.eup %1591  ;;  %v658_v58 = vpack.c.bf16 %v1590_v55, %v1586_v53 }
 0x10f   : > { %v1594_v59 = vpop.eup %1593 }
 0x110   : > { %v1596_v60 = vpop.eup %1595  ;;  %1456 = vmatprep.mubr.msk.bf16.mxu1 %vm691_vm1, %v658_v58 }
 0x111   : > { %v1598_v61 = vpop.eup %1597  ;;  %1457 = vmatmul.mubr.msk.bf16.gmra.mrb[28].mxu1 %vm691_vm1, %v659_v56  ;;  %v665_v62 = vpack.c.bf16 %v1596_v60, %v1592_v57 }
 0x112   : > { %v1600_v20 = vpop.eup %1599  ;;  %1460 = vmatprep.mubr.msk.bf16.mxu1 %vm691_vm1, %v660_v31  ;;  %v664_v63 = vpack.c.bf16 %v1598_v61, %v1594_v59 }
 0x113   : > { %v1602_v0 = vpop.eup %1601 }
 0x114   : > { %v1604_v1 = vpop.eup %1603 }
 0x115   : > { %v1606_v2 = vpop.eup %1605  ;;  %v667_v3 = vpack.c.bf16 %v1604_v1, %v1600_v20 }
 0x116   : > { %v666_v4 = vpack.c.bf16 %v1606_v2, %v1602_v0 }
 0x119   : > { %1461 = vmatmul.mubr.msk.bf16.gmra.mrb[32].mxu1 %vm691_vm1, %v661_v28 }
 0x11a   : > { %1464 = vmatprep.mubr.msk.bf16.mxu1 %vm691_vm1, %v662_v52 }
 0x121   : > { %1465 = vmatmul.mubr.msk.bf16.gmra.mrb[36].mxu1 %vm691_vm1, %v663_v50 }
 0x122   : > { %1468 = vmatprep.mubr.msk.bf16.mxu1 %vm691_vm1, %v664_v63 }
 0x129   : > { %1469 = vmatmul.mubr.msk.bf16.gmra.mrb[40].mxu1 %vm691_vm1, %v665_v62 }
 0x12a   : > { %1472 = vmatprep.mubr.msk.bf16.mxu1 %vm691_vm1, %v666_v4 }
 0x131   : > { %1473 = vmatmul.mubr.msk.bf16.gmra.mrb[44].mxu1 %vm691_vm1, %v667_v3 }
 0x1cc   : > { %v1446_v7 = vpop.f32.mrb[16].mxu1 }
 0x1cd   : > { %v783_v8 = vadd.f32 %v1446_v7, %v1847_v6  ;;  %v774_v9 = vpop.f32.mrb[17].mxu1 }
 0x1ce   : > { %v775_v10 = vadd.f32 %v1847_v6, %v774_v9  ;;  %v1447_v11 = vpop.f32.mrb[18].mxu1 }
 0x1cf   : > { %1607 = vtanh.f32 %v783_v8  ;;  %v786_v12 = vadd.f32 %v1447_v11, %v1847_v6  ;;  %v777_v13 = vpop.f32.mrb[19].mxu1 }
 0x1d0   : > { %1609 = vtanh.f32 %v775_v10  ;;  %v778_v14 = vadd.f32 %v1847_v6, %v777_v13 }
 0x1d1   : > { %1611 = vtanh.f32 %v786_v12 }
 0x1d2   : > { %1613 = vtanh.f32 %v778_v14 }
 0x1d4   : > { %v1450_v15 = vpop.f32.mrb[20].mxu1 }
 0x1d5   : > { %v799_v16 = vadd.f32 %v1450_v15, %v1847_v6  ;;  %v790_v17 = vpop.f32.mrb[21].mxu1 }
 0x1d6   : > { %v791_v18 = vadd.f32 %v1847_v6, %v790_v17  ;;  %v1451_v19 = vpop.f32.mrb[22].mxu1 }
 0x1d7   : > { %1615 = vtanh.f32 %v799_v16  ;;  %v802_v21 = vadd.f32 %v1451_v19, %v1847_v6  ;;  %v793_v22 = vpop.f32.mrb[23].mxu1 }
 0x1d8   : > { %1617 = vtanh.f32 %v791_v18  ;;  %v794_v23 = vadd.f32 %v1847_v6, %v793_v22 }
 0x1d9   : > { %v1608_v24 = vpop.eup %1607  ;;  %1619 = vtanh.f32 %v802_v21 }
 0x1da   : > { %v1610_v25 = vpop.eup %1609  ;;  %1621 = vtanh.f32 %v794_v23 }
 0x1db   : > { %v1612_v26 = vpop.eup %1611 }
 0x1dc   : > { %v1614_v27 = vpop.eup %1613  ;;  %v934_v28 = vpack.c.bf16 %v1612_v26, %v1608_v24  ;;  %v1454_v29 = vpop.f32.mrb[24].mxu1 }
 0x1dd   : > { %v815_v30 = vadd.f32 %v1454_v29, %v1847_v6  ;;  %v806_v31 = vpop.f32.mrb[25].mxu1  ;;  %v933_v32 = vpack.c.bf16 %v1614_v27, %v1610_v25 }
 0x1de   : > { %v807_v33 = vadd.f32 %v1847_v6, %v806_v31  ;;  %v1455_v34 = vpop.f32.mrb[26].mxu1 }
 0x1df   : > { %1623 = vtanh.f32 %v815_v30  ;;  %v818_v35 = vadd.f32 %v1455_v34, %v1847_v6  ;;  %v809_v36 = vpop.f32.mrb[27].mxu1  ;;  %1480 = vmatprep.mubr.msk.bf16.mxu0 %vm691_vm1, %v933_v32 }
 0x1e0   : > { %1625 = vtanh.f32 %v807_v33  ;;  %v810_v37 = vadd.f32 %v1847_v6, %v809_v36  ;;  %1481 = vmatmul.mubr.msk.bf16.vlgmr.msra.gmra.mrb[16].mxu0 %vm691_vm1, %v934_v28 }
 0x1e1   : > { %v1616_v38 = vpop.eup %1615  ;;  %1627 = vtanh.f32 %v818_v35 }
 0x1e2   : > { %v1618_v39 = vpop.eup %1617  ;;  %1629 = vtanh.f32 %v810_v37 }
 0x1e3   : > { %v1620_v40 = vpop.eup %1619 }
 0x1e4   : > { %v1622_v41 = vpop.eup %1621  ;;  %v1458_v42 = vpop.f32.mrb[28].mxu1  ;;  %v936_v43 = vpack.c.bf16 %v1620_v40, %v1616_v38 }
 0x1e5   : > { %v831_v44 = vadd.f32 %v1458_v42, %v1847_v6  ;;  %v822_v45 = vpop.f32.mrb[29].mxu1  ;;  %v935_v46 = vpack.c.bf16 %v1622_v41, %v1618_v39 }
 0x1e6   : > { %v823_v47 = vadd.f32 %v1847_v6, %v822_v45  ;;  %v1459_v48 = vpop.f32.mrb[30].mxu1 }
 0x1e7   : > { %1631 = vtanh.f32 %v831_v44  ;;  %v834_v49 = vadd.f32 %v1459_v48, %v1847_v6  ;;  %v825_v50 = vpop.f32.mrb[31].mxu1  ;;  %1484 = vmatprep.mubr.msk.bf16.mxu0 %vm691_vm1, %v935_v46 }
 0x1e8   : > { %1633 = vtanh.f32 %v823_v47  ;;  %v826_v51 = vadd.f32 %v1847_v6, %v825_v50  ;;  %1485 = vmatmul.mubr.msk.bf16.gmra.mrb[20].mxu0 %vm691_vm1, %v936_v43 }
 0x1e9   : > { %v1624_v52 = vpop.eup %1623  ;;  %1635 = vtanh.f32 %v834_v49 }
 0x1ea   : > { %v1626_v53 = vpop.eup %1625  ;;  %1637 = vtanh.f32 %v826_v51 }
 0x1eb   : > { %v1628_v54 = vpop.eup %1627 }
 0x1ec   : > { %v1630_v55 = vpop.eup %1629  ;;  %v1462_v56 = vpop.f32.mrb[32].mxu1  ;;  %v938_v57 = vpack.c.bf16 %v1628_v54, %v1624_v52 }
 0x1ed   : > { %v847_v58 = vadd.f32 %v1462_v56, %v1847_v6  ;;  %v838_v59 = vpop.f32.mrb[33].mxu1  ;;  %v937_v60 = vpack.c.bf16 %v1630_v55, %v1626_v53  ;;  %v1901_v56 = vld [vmem:[%s2013_s6] ss:$0 sm:$0xff] }
 0x1ee   : > { %v839_v61 = vadd.f32 %v1847_v6, %v838_v59  ;;  %v1463_v62 = vpop.f32.mrb[34].mxu1 }
 0x1ef   : > { %1639 = vtanh.f32 %v847_v58  ;;  %v850_v20 = vadd.f32 %v1463_v62, %v1847_v6  ;;  %v841_v63 = vpop.f32.mrb[35].mxu1  ;;  %1488 = vmatprep.mubr.msk.bf16.mxu0 %vm691_vm1, %v937_v60 }
 0x1f0   : > { %1641 = vtanh.f32 %v839_v61  ;;  %v842_v0 = vadd.f32 %v1847_v6, %v841_v63  ;;  %1489 = vmatmul.mubr.msk.bf16.gmra.mrb[24].mxu0 %vm691_vm1, %v938_v57 }
 0x1f1   : > { %v1632_v1 = vpop.eup %1631  ;;  %1643 = vtanh.f32 %v850_v20 }
 0x1f2   : > { %v1634_v2 = vpop.eup %1633  ;;  %1645 = vtanh.f32 %v842_v0 }
 0x1f3   : > { %v1636_v3 = vpop.eup %1635 }
 0x1f4   : > { %v1638_v4 = vpop.eup %1637  ;;  %v1466_v5 = vpop.f32.mrb[36].mxu1  ;;  %v940_v7 = vpack.c.bf16 %v1636_v3, %v1632_v1 }
 0x1f5   : > { %v863_v8 = vadd.f32 %v1466_v5, %v1847_v6  ;;  %v854_v9 = vpop.f32.mrb[37].mxu1  ;;  %v939_v10 = vpack.c.bf16 %v1638_v4, %v1634_v2 }
 0x1f6   : > { %v855_v11 = vadd.f32 %v1847_v6, %v854_v9  ;;  %v1467_v12 = vpop.f32.mrb[38].mxu1 }
 0x1f7   : > { %1647 = vtanh.f32 %v863_v8  ;;  %v866_v13 = vadd.f32 %v1467_v12, %v1847_v6  ;;  %v857_v14 = vpop.f32.mrb[39].mxu1  ;;  %1492 = vmatprep.mubr.msk.bf16.mxu0 %vm691_vm1, %v939_v10 }
 0x1f8   : > { %1649 = vtanh.f32 %v855_v11  ;;  %v858_v15 = vadd.f32 %v1847_v6, %v857_v14  ;;  %1493 = vmatmul.mubr.msk.bf16.gmra.mrb[28].mxu0 %vm691_vm1, %v940_v7 }
 0x1f9   : > { %v1640_v16 = vpop.eup %1639  ;;  %1651 = vtanh.f32 %v866_v13 }
 0x1fa   : > { %v1642_v17 = vpop.eup %1641  ;;  %1653 = vtanh.f32 %v858_v15 }
 0x1fb   : > { %v1644_v18 = vpop.eup %1643 }
 0x1fc   : > { %v1646_v19 = vpop.eup %1645  ;;  %v1470_v21 = vpop.f32.mrb[40].mxu1  ;;  %v942_v22 = vpack.c.bf16 %v1644_v18, %v1640_v16 }
 0x1fd   : > { %v879_v23 = vadd.f32 %v1470_v21, %v1847_v6  ;;  %v870_v24 = vpop.f32.mrb[41].mxu1  ;;  %v941_v25 = vpack.c.bf16 %v1646_v19, %v1642_v17 }
 0x1fe   : > { %v871_v26 = vadd.f32 %v1847_v6, %v870_v24  ;;  %v1471_v27 = vpop.f32.mrb[42].mxu1 }
 0x1ff   : > { %1655 = vtanh.f32 %v879_v23  ;;  %v882_v28 = vadd.f32 %v1471_v27, %v1847_v6  ;;  %v873_v29 = vpop.f32.mrb[43].mxu1  ;;  %1496 = vmatprep.mubr.msk.bf16.mxu0 %vm691_vm1, %v941_v25 }
 0x200   : > { %1657 = vtanh.f32 %v871_v26  ;;  %v874_v30 = vadd.f32 %v1847_v6, %v873_v29  ;;  %1497 = vmatmul.mubr.msk.bf16.gmra.mrb[32].mxu0 %vm691_vm1, %v942_v22 }
 0x201   : > { %v1648_v31 = vpop.eup %1647  ;;  %1659 = vtanh.f32 %v882_v28 }
 0x202   : > { %v1650_v32 = vpop.eup %1649  ;;  %1661 = vtanh.f32 %v874_v30 }
 0x203   : > { %v1652_v33 = vpop.eup %1651 }
 0x204   : > { %v1654_v34 = vpop.eup %1653  ;;  %v1474_v35 = vpop.f32.mrb[44].mxu1  ;;  %v944_v36 = vpack.c.bf16 %v1652_v33, %v1648_v31 }
 0x205   : > { %v895_v37 = vadd.f32 %v1474_v35, %v1847_v6  ;;  %v886_v38 = vpop.f32.mrb[45].mxu1  ;;  %v943_v39 = vpack.c.bf16 %v1654_v34, %v1650_v32 }
 0x206   : > { %v887_v40 = vadd.f32 %v1847_v6, %v886_v38  ;;  %v1475_v41 = vpop.f32.mrb[46].mxu1 }
 0x207   : > { %1663 = vtanh.f32 %v895_v37  ;;  %v898_v42 = vadd.f32 %v1475_v41, %v1847_v6  ;;  %v889_v43 = vpop.f32.mrb[47].mxu1  ;;  %1500 = vmatprep.mubr.msk.bf16.mxu0 %vm691_vm1, %v943_v39 }
 0x208   : > { %1665 = vtanh.f32 %v887_v40  ;;  %v890_v44 = vadd.f32 %v1847_v6, %v889_v43  ;;  %1501 = vmatmul.mubr.msk.bf16.gmra.mrb[36].mxu0 %vm691_vm1, %v944_v36 }
 0x209   : > { %v1656_v45 = vpop.eup %1655  ;;  %1667 = vtanh.f32 %v898_v42 }
 0x20a   : > { %v1658_v46 = vpop.eup %1657  ;;  %1669 = vtanh.f32 %v890_v44 }
 0x20b   : > { %v1660_v47 = vpop.eup %1659 }
 0x20c   : > { %v1662_v48 = vpop.eup %1661  ;;  %v946_v49 = vpack.c.bf16 %v1660_v47, %v1656_v45 }
 0x20d   : > { %v945_v50 = vpack.c.bf16 %v1662_v48, %v1658_v46 }
 0x20f   : > { %1504 = vmatprep.mubr.msk.bf16.mxu0 %vm691_vm1, %v945_v50 }
 0x210   : > { %1505 = vmatmul.mubr.msk.bf16.gmra.mrb[40].mxu0 %vm691_vm1, %v946_v49 }
 0x211   : > { %v1664_v51 = vpop.eup %1663 }
 0x212   : > { %v1666_v52 = vpop.eup %1665 }
 0x213   : > { %v1668_v53 = vpop.eup %1667 }
 0x214   : > { %v1670_v54 = vpop.eup %1669  ;;  %v948_v6 = vpack.c.bf16 %v1668_v53, %v1664_v51 }
 0x215   : > { %v947_v55 = vpack.c.bf16 %v1670_v54, %v1666_v52 }
 0x217   : > { %1508 = vmatprep.mubr.msk.bf16.mxu0 %vm691_vm1, %v947_v55 }
 0x218   : > { %1509 = vmatmul.mubr.msk.bf16.gmra.mrb[44].mxu0 %vm691_vm1, %v948_v6 }
 0x2b3   : > { %v1482_v57 = vpop.f32.mrb[16].mxu0 }
 0x2b4   : > { %v1063_v58 = vadd.f32 %v1482_v57, %v1901_v56  ;;  %v1054_v59 = vpop.f32.mrb[17].mxu0 }
 0x2b5   : > { %v1055_v60 = vadd.f32 %v1901_v56, %v1054_v59  ;;  %v1483_v61 = vpop.f32.mrb[18].mxu0 }
 0x2b6   : > { %1184 = vst.msk [vmem:[%s1906_s29 + $0x10] sm:$0xff] %vm1181_vm2, %v1063_v58  ;;  %v1066_v62 = vadd.f32 %v1483_v61, %v1901_v56  ;;  %v1057_v20 = vpop.f32.mrb[19].mxu0 }
 0x2b7   : > { %1182 = vst.msk [vmem:[%s1906_s29] sm:$0xff] %vm1181_vm2, %v1055_v60  ;;  %v1058_v63 = vadd.f32 %v1901_v56, %v1057_v20 }
 0x2b8   : > { %1185 = vst.msk [vmem:[%s1906_s29 + $0x18] sm:$0xff] %vm1181_vm2, %v1066_v62 }
 0x2b9   : > { %1183 = vst.msk [vmem:[%s1906_s29 + $0x8] sm:$0xff] %vm1181_vm2, %v1058_v63 }
 0x2bb   : > { %v1486_v0 = vpop.f32.mrb[20].mxu0 }
 0x2bc   : > { %v1079_v1 = vadd.f32 %v1486_v0, %v1901_v56  ;;  %v1070_v2 = vpop.f32.mrb[21].mxu0 }
 0x2bd   : > { %v1071_v3 = vadd.f32 %v1901_v56, %v1070_v2  ;;  %v1487_v4 = vpop.f32.mrb[22].mxu0 }
 0x2be   : > { %1188 = vst.msk [vmem:[%s1906_s29 + $0x30] sm:$0xff] %vm1181_vm2, %v1079_v1  ;;  %v1082_v5 = vadd.f32 %v1487_v4, %v1901_v56  ;;  %v1073_v7 = vpop.f32.mrb[23].mxu0 }
 0x2bf   : > { %1186 = vst.msk [vmem:[%s1906_s29 + $0x20] sm:$0xff] %vm1181_vm2, %v1071_v3  ;;  %v1074_v8 = vadd.f32 %v1901_v56, %v1073_v7 }
 0x2c0   : > { %1189 = vst.msk [vmem:[%s1906_s29 + $0x38] sm:$0xff] %vm1181_vm2, %v1082_v5 }
 0x2c1   : > { %1187 = vst.msk [vmem:[%s1906_s29 + $0x28] sm:$0xff] %vm1181_vm2, %v1074_v8 }
 0x2c3   : > { %v1490_v9 = vpop.f32.mrb[24].mxu0 }
 0x2c4   : > { %v1095_v10 = vadd.f32 %v1490_v9, %v1901_v56  ;;  %v1086_v11 = vpop.f32.mrb[25].mxu0 }
 0x2c5   : > { %v1087_v12 = vadd.f32 %v1901_v56, %v1086_v11  ;;  %v1491_v13 = vpop.f32.mrb[26].mxu0 }
 0x2c6   : > { %1192 = vst.msk [vmem:[%s1906_s29 + $0x50] sm:$0xff] %vm1181_vm2, %v1095_v10  ;;  %v1098_v14 = vadd.f32 %v1491_v13, %v1901_v56  ;;  %v1089_v15 = vpop.f32.mrb[27].mxu0 }
 0x2c7   : > { %1190 = vst.msk [vmem:[%s1906_s29 + $0x40] sm:$0xff] %vm1181_vm2, %v1087_v12  ;;  %v1090_v16 = vadd.f32 %v1901_v56, %v1089_v15 }
 0x2c8   : > { %1193 = vst.msk [vmem:[%s1906_s29 + $0x58] sm:$0xff] %vm1181_vm2, %v1098_v14 }
 0x2c9   : > { %1191 = vst.msk [vmem:[%s1906_s29 + $0x48] sm:$0xff] %vm1181_vm2, %v1090_v16 }
 0x2cb   : > { %v1494_v17 = vpop.f32.mrb[28].mxu0 }
 0x2cc   : > { %v1111_v18 = vadd.f32 %v1494_v17, %v1901_v56  ;;  %v1102_v19 = vpop.f32.mrb[29].mxu0 }
 0x2cd   : > { %v1103_v21 = vadd.f32 %v1901_v56, %v1102_v19  ;;  %v1495_v22 = vpop.f32.mrb[30].mxu0 }
 0x2ce   : > { %1196 = vst.msk [vmem:[%s1906_s29 + $0x70] sm:$0xff] %vm1181_vm2, %v1111_v18  ;;  %v1114_v23 = vadd.f32 %v1495_v22, %v1901_v56  ;;  %v1105_v24 = vpop.f32.mrb[31].mxu0 }
 0x2cf   : > { %1194 = vst.msk [vmem:[%s1906_s29 + $0x60] sm:$0xff] %vm1181_vm2, %v1103_v21  ;;  %v1106_v25 = vadd.f32 %v1901_v56, %v1105_v24 }
 0x2d0   : > { %1197 = vst.msk [vmem:[%s1906_s29 + $0x78] sm:$0xff] %vm1181_vm2, %v1114_v23 }
 0x2d1   : > { %1195 = vst.msk [vmem:[%s1906_s29 + $0x68] sm:$0xff] %vm1181_vm2, %v1106_v25 }
 0x2d3   : > { %v1498_v26 = vpop.f32.mrb[32].mxu0 }
 0x2d4   : > { %v1127_v27 = vadd.f32 %v1498_v26, %v1901_v56  ;;  %v1118_v28 = vpop.f32.mrb[33].mxu0 }
 0x2d5   : > { %v1119_v29 = vadd.f32 %v1901_v56, %v1118_v28  ;;  %v1499_v30 = vpop.f32.mrb[34].mxu0 }
 0x2d6   : > { %1200 = vst.msk [vmem:[%s1906_s29 + $0x90] sm:$0xff] %vm1181_vm2, %v1127_v27  ;;  %v1130_v31 = vadd.f32 %v1499_v30, %v1901_v56  ;;  %v1121_v32 = vpop.f32.mrb[35].mxu0 }
 0x2d7   : > { %1198 = vst.msk [vmem:[%s1906_s29 + $0x80] sm:$0xff] %vm1181_vm2, %v1119_v29  ;;  %v1122_v33 = vadd.f32 %v1901_v56, %v1121_v32 }
 0x2d8   : > { %1201 = vst.msk [vmem:[%s1906_s29 + $0x98] sm:$0xff] %vm1181_vm2, %v1130_v31 }
 0x2d9   : > { %1199 = vst.msk [vmem:[%s1906_s29 + $0x88] sm:$0xff] %vm1181_vm2, %v1122_v33 }
 0x2db   : > { %v1502_v34 = vpop.f32.mrb[36].mxu0 }
 0x2dc   : > { %v1143_v35 = vadd.f32 %v1502_v34, %v1901_v56  ;;  %v1134_v36 = vpop.f32.mrb[37].mxu0 }
 0x2dd   : > { %v1135_v37 = vadd.f32 %v1901_v56, %v1134_v36  ;;  %v1503_v38 = vpop.f32.mrb[38].mxu0 }
 0x2de   : > { %1204 = vst.msk [vmem:[%s1906_s29 + $0xb0] sm:$0xff] %vm1181_vm2, %v1143_v35  ;;  %v1146_v39 = vadd.f32 %v1503_v38, %v1901_v56  ;;  %v1137_v40 = vpop.f32.mrb[39].mxu0 }
 0x2df   : > { %1202 = vst.msk [vmem:[%s1906_s29 + $0xa0] sm:$0xff] %vm1181_vm2, %v1135_v37  ;;  %v1138_v41 = vadd.f32 %v1901_v56, %v1137_v40 }
 0x2e0   : > { %1205 = vst.msk [vmem:[%s1906_s29 + $0xb8] sm:$0xff] %vm1181_vm2, %v1146_v39 }
 0x2e1   : > { %1203 = vst.msk [vmem:[%s1906_s29 + $0xa8] sm:$0xff] %vm1181_vm2, %v1138_v41 }
 0x2e3   : > { %v1506_v42 = vpop.f32.mrb[40].mxu0 }
 0x2e4   : > { %v1159_v43 = vadd.f32 %v1506_v42, %v1901_v56  ;;  %v1150_v44 = vpop.f32.mrb[41].mxu0 }
 0x2e5   : > { %v1151_v45 = vadd.f32 %v1901_v56, %v1150_v44  ;;  %v1507_v46 = vpop.f32.mrb[42].mxu0 }
 0x2e6   : > { %1208 = vst.msk [vmem:[%s1906_s29 + $0xd0] sm:$0xff] %vm1181_vm2, %v1159_v43  ;;  %v1162_v47 = vadd.f32 %v1507_v46, %v1901_v56  ;;  %v1153_v48 = vpop.f32.mrb[43].mxu0 }
 0x2e7   : > { %1206 = vst.msk [vmem:[%s1906_s29 + $0xc0] sm:$0xff] %vm1181_vm2, %v1151_v45  ;;  %v1154_v49 = vadd.f32 %v1901_v56, %v1153_v48 }
 0x2e8   : > { %1209 = vst.msk [vmem:[%s1906_s29 + $0xd8] sm:$0xff] %vm1181_vm2, %v1162_v47 }
 0x2e9   : > { %1207 = vst.msk [vmem:[%s1906_s29 + $0xc8] sm:$0xff] %vm1181_vm2, %v1154_v49 }
 0x2eb   : > { %v1510_v50 = vpop.f32.mrb[44].mxu0 }
 0x2ec   : > { %v1175_v51 = vadd.f32 %v1510_v50, %v1901_v56  ;;  %v1166_v52 = vpop.f32.mrb[45].mxu0 }
 0x2ed   : > { %v1167_v53 = vadd.f32 %v1901_v56, %v1166_v52  ;;  %v1511_v54 = vpop.f32.mrb[46].mxu0 }
 0x2ee   : > { %1212 = vst.msk [vmem:[%s1906_s29 + $0xf0] sm:$0xff] %vm1181_vm2, %v1175_v51  ;;  %v1178_v6 = vadd.f32 %v1511_v54, %v1901_v56  ;;  %v1169_v55 = vpop.f32.mrb[47].mxu0 }
 0x2ef   : > { %1210 = vst.msk [vmem:[%s1906_s29 + $0xe0] sm:$0xff] %vm1181_vm2, %v1167_v53  ;;  %v1170_v57 = vadd.f32 %v1901_v56, %v1169_v55 }
 0x2f0   : > { %1213 = vst.msk [vmem:[%s1906_s29 + $0xf8] sm:$0xff] %vm1181_vm2, %v1178_v6 }
 0x2f1   : > { %1211 = vst.msk [vmem:[%s1906_s29 + $0xe8] sm:$0xff] %vm1181_vm2, %v1170_v57 }
 0x2f2 PF: > { %s17_s24 = sadd.s32 1, %s1677_s24  }
 0x2f3   : > { %p14_p4 = scmp.ge.s32.totalorder %s17_s24, 6  }
 0x2f5   :  { %16 = sbr.rel (!%p14_p4) target bundleno = 1 (0x1), region = 78 }

</bundles_post_ra>
